<compile_context>
chip_gen: v5e
topology: v5e:2x2
jax: 0.10.0
libtpu: 0.0.40
codegen_flags: <defaults>
</compile_context>

<pallas_src>
import jax
import jax.numpy as jnp
from jax.experimental import pallas as pl
from jax.experimental.pallas import tpu as pltpu


# ----------------------------------------------------------------------------
# Pallas kernel: fused 2-layer MLP, single lane-dense output
#   h = relu(x @ W1 + b1)        (bf16 operands, f32 accumulate, f32 bias/ReLU)
#   y = h @ W2 + b2              (one wide GEMM over the full out_dim)
# ----------------------------------------------------------------------------
def aux_mlp_kernel(x_ref, w1_ref, b1_ref, w2_ref, b2_ref, o_ref):
    h = jnp.dot(x_ref[...], w1_ref[...],
                preferred_element_type=jnp.float32) + b1_ref[...]
    h = jnp.maximum(h, 0.0)                                   # act = ReLU (VPU)
    # bf16 re-cast matches default-precision MXU truncation; keeps native rate.
    y = jnp.dot(h.astype(jnp.bfloat16), w2_ref[...],
                preferred_element_type=jnp.float32) + b2_ref[...]
    o_ref[...] = y


def _round_up(x, m):
    return ((x + m - 1) // m) * m


def aux_network_forward(rep, params, input_matrix_dim, rank, output_matrix_dim,
                        *, tm=None):
    """Forward pass of AuxNetwork (combine=True, MLP backbone).

    rep: (..., rep_dim), any float dtype.
    Returns (lora_input_matrix_, lora_output_matrix_) with shapes
    (N, input_matrix_dim*rank) and (N, output_matrix_dim*rank), N = prod(leading).
    """
    w1, b1, w2, b2 = params
    rep_ = rep.reshape(-1, rep.shape[-1])            # rep.view(-1, rep.shape[-1])

    n, rep_dim = rep_.shape
    hidden = w1.shape[-1]
    out_dim = w2.shape[-1]
    d_in = input_matrix_dim * rank
    d_out = output_matrix_dim * rank
    assert out_dim == d_in + d_out

    # --- normalize / cast operands (pure glue, done once) --------------------
    b1 = jnp.asarray(b1).reshape(1, hidden).astype(jnp.float32)
    b2 = jnp.asarray(b2).reshape(1, out_dim).astype(jnp.float32)
    x = rep_.astype(jnp.bfloat16)                     # MXU-native operand dtype
    w1b = w1.astype(jnp.bfloat16)
    w2b = w2.astype(jnp.bfloat16)

    # --- generation-aware limits ---------------------------------------------
    try:
        phys_vmem = pltpu.get_tpu_info().vmem_capacity_bytes
    except Exception:
        phys_vmem = 64 * 1024 * 1024                  # conservative (v7x-sized)
    vmem_limit = int(min(112 * 1024 * 1024, (phys_vmem * 3) // 4))  # 96M v5e/v6e, 48M v7x
    if tm is None:
        tm = 1024 if phys_vmem >= 128 * 1024 * 1024 else 512

    # --- row tile selection ---------------------------------------------------
    # Multiple of 16 (bf16 sublane packing), 128/256-aligned when large (MXU M),
    # and capped so there are >=2 grid steps (v7x megacore + DMA/compute overlap).
    n_pad16 = _round_up(n, 16)
    if n_pad16 <= 16:
        tm_eff = n_pad16
    else:
        tm_eff = min(tm, _round_up(pl.cdiv(n, 2), 16))
        if tm_eff >= 256:
            tm_eff = (tm_eff // 256) * 256
        elif tm_eff >= 128:
            tm_eff = (tm_eff // 128) * 128

    # Shrink the row tile if the double-buffered x/out tiles would not fit next
    # to the resident (double-buffered) bf16 weights within the VMEM limit.
    weight_resident = 2 * 2 * (rep_dim * hidden + hidden * out_dim)   # bf16, 2 bufs
    bias_resident = 2 * 4 * (hidden + out_dim)
    per_row = 2 * (2 * rep_dim + 4 * out_dim)          # x bf16 + out f32, 2 bufs
    avail = vmem_limit - weight_resident - bias_resident - (2 << 20)
    if avail > 0:
        max_rows = max(16, (avail // per_row) // 16 * 16)
        tm_eff = min(tm_eff, max_rows)
    # TODO(synk): if the weights alone exceed the VMEM limit (very large
    # rep_dim on v7x), a hidden/out column grid axis would be needed; not
    # required at the shapes this module uses.

    grid = (pl.cdiv(n, tm_eff),)   # partial last tile: padded reads, clipped writes

    cost = pl.CostEstimate(
        flops=2 * n * rep_dim * hidden + 2 * n * hidden * out_dim,
        transcendentals=0,
        bytes_accessed=(x.size * 2 + w1b.size * 2 + w2b.size * 2
                        + b1.size * 4 + b2.size * 4 + n * out_dim * 4),
    )

    out = pl.pallas_call(
        aux_mlp_kernel,
        out_shape=jax.ShapeDtypeStruct((n, out_dim), jnp.float32),
        grid=grid,
        in_specs=[
            pl.BlockSpec((tm_eff, rep_dim), lambda i: (i, 0)),   # x tile (pipelined)
            pl.BlockSpec((rep_dim, hidden), lambda i: (0, 0)),   # W1 (resident)
            pl.BlockSpec((1, hidden), lambda i: (0, 0)),         # b1
            pl.BlockSpec((hidden, out_dim), lambda i: (0, 0)),   # W2 (resident)
            pl.BlockSpec((1, out_dim), lambda i: (0, 0)),        # b2
        ],
        out_specs=pl.BlockSpec((tm_eff, out_dim), lambda i: (i, 0)),
        compiler_params=pltpu.CompilerParams(
            dimension_semantics=("parallel",),          # megacore sharding on v7x
            vmem_limit_bytes=vmem_limit),
        cost_estimate=cost,
    )(x, w1b, b1, w2b, b2)

    # output.split([d_in, d_out], -1)
    lora_input_matrix_ = out[:, :d_in]
    lora_output_matrix_ = out[:, d_in:]
    return lora_input_matrix_, lora_output_matrix_


# ----------------------------------------------------------------------------
# Deterministic parameter construction (mirrors nn.Linear default init shapes)
# ----------------------------------------------------------------------------
def init_aux_params(key, rep_dim, input_matrix_dim, rank, output_matrix_dim):
    hidden = rep_dim * 2                              # combined_net hidden = rep_dim*2
    out_dim = input_matrix_dim * rank + output_matrix_dim * rank
    k1, k2, k3, k4 = jax.random.split(key, 4)
    # PyTorch Linear: U(-1/sqrt(fan_in), 1/sqrt(fan_in)); stored transposed here.
    lim1 = 1.0 / jnp.sqrt(rep_dim)
    lim2 = 1.0 / jnp.sqrt(hidden)
    w1 = jax.random.uniform(k1, (rep_dim, hidden), jnp.float32, -lim1, lim1)
    b1 = jax.random.uniform(k2, (hidden,), jnp.float32, -lim1, lim1)
    w2 = jax.random.uniform(k3, (hidden, out_dim), jnp.float32, -lim2, lim2)
    b2 = jax.random.uniform(k4, (out_dim,), jnp.float32, -lim2, lim2)
    return (w1, b1, w2, b2)


if __name__ == "__main__":
    # Small shapes consistent with AuxNetwork.forward:
    #   rep: (batch=2, seq=8, rep_dim=32)
    #   input_matrix_dim=4, output_matrix_dim=4, rank=2  ->  out split 8 / 8
    batch, seq, rep_dim = 2, 8, 32
    input_matrix_dim, rank, output_matrix_dim = 4, 2, 4

    key = jax.random.PRNGKey(0)
    k_rep, k_par = jax.random.split(key)
    rep = jax.random.normal(
        k_rep, (batch, seq, rep_dim), dtype=jnp.float32).astype(jnp.bfloat16)
    params = init_aux_params(k_par, rep_dim, input_matrix_dim, rank,
                             output_matrix_dim)

    lora_in, lora_out = aux_network_forward(
        rep, params, input_matrix_dim, rank, output_matrix_dim)
    jax.block_until_ready((lora_in, lora_out))

    # Pure-JAX reference of the same math (bf16 MXU operands, f32 accumulate).
    w1, b1, w2, b2 = params
    xr = rep.astype(jnp.bfloat16).reshape(-1, rep_dim)
    h = jnp.dot(xr, w1.astype(jnp.bfloat16),
                preferred_element_type=jnp.float32) + b1.reshape(1, -1)
    h = jnp.maximum(h, 0.0)
    ref = jnp.dot(h.astype(jnp.bfloat16), w2.astype(jnp.bfloat16),
                  preferred_element_type=jnp.float32) + b2.reshape(1, -1)
    d_in = input_matrix_dim * rank
    ref_in, ref_out = ref[:, :d_in], ref[:, d_in:]

    assert lora_in.shape == (batch * seq, d_in)
    assert lora_out.shape == (batch * seq, output_matrix_dim * rank)
    assert jnp.allclose(lora_in, ref_in, atol=2e-3, rtol=2e-3)
    assert jnp.allclose(lora_out, ref_out, atol=2e-3, rtol=2e-3)

    print("KERNEL_OK")
</pallas_src>

<mosaic_0001>
module attributes {stable_mosaic.version = 11 : i64} {
  func.func @aux_mlp_kernel(%arg0: i32, %arg1: memref<16x32xbf16, #tpu.memory_space<vmem>>, %arg2: memref<32x64xbf16, #tpu.memory_space<vmem>>, %arg3: memref<1x64xf32, #tpu.memory_space<vmem>>, %arg4: memref<64x16xbf16, #tpu.memory_space<vmem>>, %arg5: memref<1x16xf32, #tpu.memory_space<vmem>>, %arg6: memref<16x16xf32, #tpu.memory_space<vmem>>) attributes {dimension_semantics = [#tpu.dimension_semantics<parallel>], iteration_bounds = array<i64: 1>, scalar_prefetch = 0 : i64, scratch_operands = 0 : i64, tpu.core_type = #tpu.core_type<tc>, window_params = [{transform_indices = @transform_0, window_bounds = array<i64: 16, 32>}, {pipeline_mode = #tpu.pipeline_mode<synchronous>, transform_indices = @transform_1, window_bounds = array<i64: 32, 64>}, {pipeline_mode = #tpu.pipeline_mode<synchronous>, transform_indices = @transform_2, window_bounds = array<i64: 1, 64>}, {pipeline_mode = #tpu.pipeline_mode<synchronous>, transform_indices = @transform_3, window_bounds = array<i64: 64, 16>}, {pipeline_mode = #tpu.pipeline_mode<synchronous>, transform_indices = @transform_4, window_bounds = array<i64: 1, 16>}, {transform_indices = @transform_5, window_bounds = array<i64: 16, 16>}]} {
    %c0 = arith.constant 0 : index
    %c0_0 = arith.constant 0 : index
    %0 = vector.load %arg1[%c0, %c0_0] : memref<16x32xbf16, #tpu.memory_space<vmem>>, vector<16x32xbf16>
    %c0_1 = arith.constant 0 : index
    %c0_2 = arith.constant 0 : index
    %1 = vector.load %arg2[%c0_1, %c0_2] : memref<32x64xbf16, #tpu.memory_space<vmem>>, vector<32x64xbf16>
    %cst = arith.constant dense<0.000000e+00> : vector<16x64xf32>
    %2 = tpu.matmul %0, %1, %cst {dimension_numbers = #tpu.dot_dimension_numbers<[1], [0], [0], [1], [0, 0, 1, 1], [], []>} : vector<16x32xbf16>, vector<32x64xbf16>, vector<16x64xf32> -> vector<16x64xf32>
    %c0_3 = arith.constant 0 : index
    %c0_4 = arith.constant 0 : index
    %3 = vector.load %arg3[%c0_3, %c0_4] : memref<1x64xf32, #tpu.memory_space<vmem>>, vector<1x64xf32>
    %4 = vector.broadcast %3 : vector<1x64xf32> to vector<16x64xf32>
    %5 = arith.addf %2, %4 : vector<16x64xf32>
    %cst_5 = arith.constant 0.000000e+00 : f32
    %6 = vector.broadcast %cst_5 : f32 to vector<16x64xf32>
    %7 = arith.maximumf %5, %6 : vector<16x64xf32>
    %8 = arith.truncf %7 : vector<16x64xf32> to vector<16x64xbf16>
    %c0_6 = arith.constant 0 : index
    %c0_7 = arith.constant 0 : index
    %9 = vector.load %arg4[%c0_6, %c0_7] : memref<64x16xbf16, #tpu.memory_space<vmem>>, vector<64x16xbf16>
    %cst_8 = arith.constant dense<0.000000e+00> : vector<16x16xf32>
    %10 = tpu.matmul %8, %9, %cst_8 {dimension_numbers = #tpu.dot_dimension_numbers<[1], [0], [0], [1], [0, 0, 1, 1], [], []>} : vector<16x64xbf16>, vector<64x16xbf16>, vector<16x16xf32> -> vector<16x16xf32>
    %c0_9 = arith.constant 0 : index
    %c0_10 = arith.constant 0 : index
    %11 = vector.load %arg5[%c0_9, %c0_10] : memref<1x16xf32, #tpu.memory_space<vmem>>, vector<1x16xf32>
    %12 = vector.broadcast %11 : vector<1x16xf32> to vector<16x16xf32>
    %13 = arith.addf %10, %12 : vector<16x16xf32>
    %c0_11 = arith.constant 0 : index
    %c0_12 = arith.constant 0 : index
    %14 = vector.load %arg6[%c0_11, %c0_12] : memref<16x16xf32, #tpu.memory_space<vmem>>, vector<16x16xf32>
    tpu.vector_store %arg6[%c0_11, %c0_12], %13 {strides = array<i32>} : memref<16x16xf32, #tpu.memory_space<vmem>>, vector<16x16xf32>,
    return
  }
  func.func @transform_0(%arg0: i32) -> (i32, i32) {
    %c0_i32 = arith.constant 0 : i32
    %c0_i32_0 = arith.constant 0 : i32
    return %arg0, %c0_i32 : i32, i32
  }
  func.func @transform_1(%arg0: i32) -> (i32, i32) {
    %c0_i32 = arith.constant 0 : i32
    %c0_i32_0 = arith.constant 0 : i32
    %c0_i32_1 = arith.constant 0 : i32
    return %c0_i32, %c0_i32_0 : i32, i32
  }
  func.func @transform_2(%arg0: i32) -> (i32, i32) {
    %c0_i32 = arith.constant 0 : i32
    %c0_i32_0 = arith.constant 0 : i32
    %c0_i32_1 = arith.constant 0 : i32
    return %c0_i32, %c0_i32_0 : i32, i32
  }
  func.func @transform_3(%arg0: i32) -> (i32, i32) {
    %c0_i32 = arith.constant 0 : i32
    %c0_i32_0 = arith.constant 0 : i32
    %c0_i32_1 = arith.constant 0 : i32
    return %c0_i32, %c0_i32_0 : i32, i32
  }
  func.func @transform_4(%arg0: i32) -> (i32, i32) {
    %c0_i32 = arith.constant 0 : i32
    %c0_i32_0 = arith.constant 0 : i32
    %c0_i32_1 = arith.constant 0 : i32
    return %c0_i32, %c0_i32_0 : i32, i32
  }
  func.func @transform_5(%arg0: i32) -> (i32, i32) {
    %c0_i32 = arith.constant 0 : i32
    %c0_i32_0 = arith.constant 0 : i32
    return %arg0, %c0_i32 : i32, i32
  }
}

</mosaic_0001>

<bundles_post_ra>
// kernel: tpu_custom_call.1
= control target key start
LH: loop header
LB: loop body
LE: loop exit
PB: predicated region body
PF: predicated region fallthrough
CT: control target
= control target key end

     0   :  { %s276_s0 = inlined_call_operand.vmem [shape: bf16[16,32], index: 0, kind: input, shape index: {}]   ;;  %s277_s1 = inlined_call_operand.vmem [shape: bf16[32,64], index: 1, kind: input, shape index: {}]   ;;  %s278_s2 = inlined_call_operand.vmem [shape: f32[1,64], index: 2, kind: input, shape index: {}]   ;;  %s279_s3 = inlined_call_operand.vmem [shape: bf16[64,16], index: 3, kind: input, shape index: {}]   ;;  %s280_s4 = inlined_call_operand.vmem [shape: f32[1,16], index: 4, kind: input, shape index: {}]   ;;  %s281_s5 = inlined_call_operand.hbm [shape: f32[16,16], index: 5, kind: output, shape index: {}]  }
   0x1   :  { %v177_v0 = vld [vmem:[%s277_s1 + $0x8] sm:$0xff]  ;;  %v176_v1 = vld [vmem:[%s277_s1] sm:$0xff] }
   0x2   :  { %59 = vmatpush.bf16.msra.mxu0 %v177_v0 }
   0x3   :  { %10 = vsyncpa [#allocation3], 0  ;;  %v175_v2 = vld [vmem:[%s276_s0] sm:$0xff]  ;;  %vm49_vm0 = vcmask 261120   ;;  %v181_v3 = vld [vmem:[%s279_s3 + $0x18] sm:$0xff]  ;;  %vm106_vm1 = vcmask 523264  }
   0x4   :  { %114 = vmatpush.bf16.msra.mxu1 %v181_v3  ;;  %v180_v4 = vld [vmem:[%s279_s3 + $0x10] sm:$0xff]  ;;  %v179_v5 = vld [vmem:[%s279_s3 + $0x8] sm:$0xff]  ;;  %v178_v6 = vld [vmem:[%s279_s3] sm:$0xff]  ;;  %vm124_vm2 = vcmask 130048   ;;  %s213_s3 = smov [#allocation2]   ;;  %s133_s11 = sshll.u32 %s281_s5, 4  ;;  %s134_s11 = int_to_ptr.hbm [resolvable:$true] %s133_s11 }
   0x5   :  { %v185_v8 = vld [vmem:[%s278_s2] ss:$0 sm:$0xff]  ;;  %s131_s9 = sshll.u32 %s213_s3, 4  ;;  %s214_s12 = smov 128   ;;  %s132_s9 = int_to_ptr.vmem [resolvable:$true] %s131_s9 }
   0x6   :  { %60 = vmatpush.bf16.msra.mxu0 %v176_v1  ;;  %v186_v15 = vld [vmem:[%s280_s4] ss:$0 sm:$0xff]  ;;  %s215_s13 = smov 8  }
   0x8   :  { %115 = vmatpush.bf16.msra.mxu1 %v180_v4 }
   0x9   :  { %157 = vmatmul.msk.bf16.vlgmr.msra.gmra.mxu0 %vm49_vm0, %v175_v2 }
   0xc   :  { %116 = vmatpush.bf16.msra.mxu1 %v179_v5 }
  0x10   :  { %117 = vmatpush.bf16.msra.mxu1 %v178_v6 }
  0x86   :  { %v62_v7 = vpop.f32.mrf.mxu0 }
  0x87   :  { %v63_v9 = vadd.f32 %v185_v8, %v62_v7 }
  0x89   :  { %v67_v12 = vmax.f32 %v63_v9, 0.0 }
  0x8e   :  { %v64_v10 = vpop.f32.mrf.mxu0 }
  0x8f   :  { %v65_v11 = vadd.f32 %v185_v8, %v64_v10 }
  0x91   :  { %v68_v13 = vmax.f32 %v65_v11, 0.0 }
  0x93   :  { %v69_v14 = vpack.c.bf16 %v68_v13, %v67_v12 }
  0x95   :  { %174 = vmatmul.msk.bf16.vlgmr.msra.gmra.mxu1 %vm106_vm1, %v69_v14 }
 0x112   :  { %v119_v16 = vpop.f32.mrf.mxu1 }
 0x113   :  { %v120_v17 = vadd.f32 %v186_v15, %v119_v16 }
 0x115   :  { %125 = vst.msk [vmem:[#allocation2] sm:$0xff] %vm124_vm2, %v120_v17 }
 0x11a   :  { %v121_v18 = vpop.f32.mrf.mxu1 }
 0x11b   :  { %v122_v19 = vadd.f32 %v186_v15, %v121_v18 }
 0x11d   :  { %126 = vst.msk [vmem:[#allocation2 + $0x8] sm:$0xff] %vm124_vm2, %v122_v19 }
 0x11e   :  { %139 = dma.vmem_to_hbm [thread:$0]  %s132_s9, 256, %s134_s11, [#allocation3], %s214_s12, %s214_s12, %s215_s13  }
 0x11f   :  { %211 = dma.done.wait [#allocation3], 256  }
 0x120   :  { %212 = vsyncadd [#allocation3], 4294967040 }
 0x121   :  { %144 = vsyncpa [#allocation3], 1 }

</bundles_post_ra>
